<compile_context>
chip_gen: v7x
topology: tpu7x:2x2x1
jax: 0.10.0
libtpu: 0.0.40
codegen_flags: <defaults>
</compile_context>

<pallas_src>
import functools

import jax
import jax.numpy as jnp
from jax import lax
from jax.experimental import pallas as pl
from jax.experimental.pallas import tpu as pltpu


_LANE = 128
_NEG_BIG = -1e30          # finite "-inf": padded lanes never create inf-inf NaNs
_VMEM_BUDGET = None


def _round_up(x, m):
    return -(-x // m) * m


def _vmem_budget_bytes():
    """~75% of this chip's physical VMEM (v5e/v6e: 128 MiB, v7x: 64 MiB)."""
    global _VMEM_BUDGET
    if _VMEM_BUDGET is None:
        try:
            cap = int(pltpu.get_tpu_info().vmem_capacity_bytes)
        except Exception:
            cap = 64 << 20            # conservative fallback (v7x-sized)
        _VMEM_BUDGET = (cap * 3) // 4
    return _VMEM_BUDGET


def _gather_rows(idx_sref, table_ref, rows_ref, block_rows, unroll):
    """rows_ref[r, :] = table[idx[base + r], :] for r in [0, block_rows)."""
    base = pl.program_id(0) * block_rows

    def gather_row(r):
        tok = idx_sref[base + r]                                    # SMEM scalar
        rows_ref[pl.ds(r, 1), :] = table_ref[pl.ds(tok, 1), :]      # VMEM row gather

    if unroll is None:                       # small static trip count: full unroll
        for r in range(block_rows):
            gather_row(r)
    else:                                    # large blocks: partially unrolled loop
        def body(r, carry):
            gather_row(r)
            return carry
        lax.fori_loop(0, block_rows, body, 0, unroll=unroll)


def _ce_body(idx_sref, table_ref, tgt_ref, rows_ref, rowloss_ref, *,
             vocab, n_rows, block_rows, unroll):
    """Gather a (tm, Vp) block of logits + batched per-row cross-entropy."""
    _gather_rows(idx_sref, table_ref, rows_ref, block_rows, unroll)

    rows = rows_ref[...]                                            # one full-tile load
    vp = rows.shape[-1]
    col = lax.broadcasted_iota(jnp.int32, (block_rows, vp), 1)      # lane ids
    masked = jnp.where(col < vocab, rows, _NEG_BIG)                 # mask padded lanes

    # numerically stable log-sum-exp over real vocab lanes, whole block at once
    m = jnp.max(masked, axis=-1, keepdims=True)                     # (tm, 1)
    s = jnp.sum(jnp.exp(masked - m), axis=-1, keepdims=True)
    lse = m + jnp.log(s)                                            # (tm, 1)

    tgt = tgt_ref[...]                                              # (tm, 1) int32
    picked = jnp.sum(jnp.where(col == tgt, rows, 0.0),
                     axis=-1, keepdims=True)                        # logits[r, tgt[r]]

    base = pl.program_id(0) * block_rows
    row_id = base + lax.broadcasted_iota(jnp.int32, (block_rows, 1), 0)
    rowloss_ref[...] = jnp.where(row_id < n_rows, lse - picked, 0.0)


def _bigram_ce_kernel(idx_sref, table_ref, tgt_ref, logits_ref, rowloss_ref, *,
                      vocab, n_rows, block_rows, unroll):
    # Gather directly into the logits output tile (stays in VMEM), then compute.
    _ce_body(idx_sref, table_ref, tgt_ref, logits_ref, rowloss_ref,
             vocab=vocab, n_rows=n_rows, block_rows=block_rows, unroll=unroll)


def _bigram_ce_loss_only_kernel(idx_sref, table_ref, tgt_ref, rowloss_ref,
                                rows_scratch, *, vocab, n_rows, block_rows, unroll):
    # Training fast path: gather into a VMEM scratch, no logits HBM writeback.
    _ce_body(idx_sref, table_ref, tgt_ref, rows_scratch, rowloss_ref,
             vocab=vocab, n_rows=n_rows, block_rows=block_rows, unroll=unroll)


def _bigram_logits_kernel(idx_sref, table_ref, logits_ref, *, block_rows, unroll):
    # targets=None path: embedding row gather only.
    _gather_rows(idx_sref, table_ref, logits_ref, block_rows, unroll)


@functools.partial(jax.jit, static_argnames=("vocab", "has_targets", "loss_only"))
def _forward_jit(idx, table_p, targets, *, vocab, has_targets, loss_only):
    B, T = idx.shape
    V = vocab
    Vp = table_p.shape[1]
    N = B * T

    # Per-generation VMEM budget -> row-block size (multiple of 8, target 512).
    budget = _vmem_budget_bytes()
    table_bytes = 2 * 4 * table_p.shape[0] * Vp          # resident table (2 buffers)
    # TODO(synk): for vocab so large the f32 table cannot sit in VMEM, fall back to
    # a pl.ANY table + manual per-row async_copy gather; not needed at these sizes.
    per_row_bytes = 2 * 4 * Vp + 2 * 4 + 2 * 4           # logits tile + tgt col + row loss
    avail = budget - table_bytes - (2 << 20)
    tm_cap = max(8, (max(avail, 0) // per_row_bytes) // 8 * 8)
    tm = max(8, min(512, tm_cap, _round_up(N, 8)))       # rows per grid step
    Np = _round_up(N, tm)
    nblk = Np // tm
    unroll = None if tm <= 64 else 8                     # full unroll vs fori(unroll=8)

    idx_flat = jnp.pad(idx.reshape(N).astype(jnp.int32), (0, Np - N))

    table_spec = pl.BlockSpec((table_p.shape[0], Vp), lambda i, *_: (0, 0))  # VMEM resident
    logits_spec = pl.BlockSpec((tm, Vp), lambda i, *_: (i, 0))
    rowloss_spec = pl.BlockSpec((tm, 1), lambda i, *_: (i, 0))
    tgt_spec = pl.BlockSpec((tm, 1), lambda i, *_: (i, 0))

    cparams = pltpu.CompilerParams(
        dimension_semantics=("parallel",),               # every row block independent
        vmem_limit_bytes=int(budget))

    if not has_targets:
        kernel = functools.partial(_bigram_logits_kernel,
                                   block_rows=tm, unroll=unroll)
        logits_p = pl.pallas_call(
            kernel,
            out_shape=jax.ShapeDtypeStruct((Np, Vp), jnp.float32),
            grid_spec=pltpu.PrefetchScalarGridSpec(
                num_scalar_prefetch=1, grid=(nblk,),
                in_specs=[table_spec],
                out_specs=logits_spec),
            compiler_params=cparams,
        )(idx_flat, table_p)
        if Np != N:
            logits_p = logits_p[:N]
        if Vp != V:
            logits_p = logits_p[:, :V]
        return logits_p.reshape(B, T, V), None

    tgt_col = jnp.pad(targets.reshape(N).astype(jnp.int32),
                      (0, Np - N)).reshape(Np, 1)
    kw = dict(vocab=V, n_rows=N, block_rows=tm, unroll=unroll)

    if loss_only:
        kernel = functools.partial(_bigram_ce_loss_only_kernel, **kw)
        row_loss = pl.pallas_call(
            kernel,
            out_shape=jax.ShapeDtypeStruct((Np, 1), jnp.float32),
            grid_spec=pltpu.PrefetchScalarGridSpec(
                num_scalar_prefetch=1, grid=(nblk,),
                in_specs=[table_spec, tgt_spec],
                out_specs=rowloss_spec,
                scratch_shapes=[pltpu.VMEM((tm, Vp), jnp.float32)]),
            compiler_params=cparams,
        )(idx_flat, table_p, tgt_col)
        return None, jnp.sum(row_loss) / N

    kernel = functools.partial(_bigram_ce_kernel, **kw)
    logits_p, row_loss = pl.pallas_call(
        kernel,
        out_shape=(jax.ShapeDtypeStruct((Np, Vp), jnp.float32),
                   jax.ShapeDtypeStruct((Np, 1), jnp.float32)),
        grid_spec=pltpu.PrefetchScalarGridSpec(
            num_scalar_prefetch=1, grid=(nblk,),
            in_specs=[table_spec, tgt_spec],
            out_specs=(logits_spec, rowloss_spec)),
        compiler_params=cparams,
    )(idx_flat, table_p, tgt_col)

    if Np != N:
        logits_p = logits_p[:N]
    if Vp != V:
        logits_p = logits_p[:, :V]
    # Match the torch module: with targets, logits are returned flattened (B*T, V).
    return logits_p, jnp.sum(row_loss) / N


class BigramLanguageBaseModelPallas:
    """JAX/Pallas port of BigramLanguageBaseModel (forward pass)."""

    def __init__(self, vocab_size: int, key=None):
        if key is None:
            key = jax.random.PRNGKey(0)
        self.vocab_size = int(vocab_size)
        # nn.Embedding default init: N(0, 1)
        self.token_embedding_table = jax.random.normal(
            key, (self.vocab_size, self.vocab_size), dtype=jnp.float32)
        # Pad the vocab (lane) dim to a multiple of 128 ONCE at init, so forward
        # never re-pads / re-writes the table in HBM on every call.
        vp = _round_up(self.vocab_size, _LANE)
        if vp != self.vocab_size:
            self._table_padded = jnp.pad(
                self.token_embedding_table,
                ((0, 0), (0, vp - self.vocab_size)))
        else:
            self._table_padded = self.token_embedding_table

    def __call__(self, idx, targets=None, loss_only=False):
        has_targets = targets is not None
        logits, loss = _forward_jit(
            idx, self._table_padded, targets,
            vocab=self.vocab_size,
            has_targets=has_targets,
            loss_only=bool(loss_only and has_targets))
        if not has_targets:
            return logits, None
        return logits, loss

    # TODO(synk): `generate` is a host-side autoregressive torch.multinomial
    # sampling loop; not a kernel hot path, left out of the Pallas port.


def _reference_forward(idx, table, targets):
    """Pure-JAX reference for validation."""
    logits = table[idx]                                  # (B, T, V)
    B, T, V = logits.shape
    lf = logits.reshape(B * T, V)
    tf = targets.reshape(B * T)
    m = jnp.max(lf, axis=-1)
    lse = m + jnp.log(jnp.sum(jnp.exp(lf - m[:, None]), axis=-1))
    picked = jnp.take_along_axis(lf, tf[:, None], axis=-1)[:, 0]
    loss = jnp.mean(lse - picked)
    return logits, loss


if __name__ == "__main__":
    key = jax.random.PRNGKey(0)
    k_tab, k_idx, k_tgt = jax.random.split(key, 3)

    vocab_size = 32
    B, T = 2, 8

    model = BigramLanguageBaseModelPallas(vocab_size, key=k_tab)
    idx = jax.random.randint(k_idx, (B, T), 0, vocab_size, dtype=jnp.int32)
    targets = jax.random.randint(k_tgt, (B, T), 0, vocab_size, dtype=jnp.int32)

    # Training-style call: (B*T, V) logits + scalar mean cross-entropy (torch semantics).
    logits, loss = model(idx, targets)
    logits = jax.block_until_ready(logits)
    loss = jax.block_until_ready(loss)

    # Inference-style call: (B, T, V) logits, loss=None.
    logits3d, loss_none = model(idx, None)
    logits3d = jax.block_until_ready(logits3d)
    assert loss_none is None

    # Loss-only fast path (drops the logits HBM writeback).
    _, loss_fast = model(idx, targets, loss_only=True)
    loss_fast = jax.block_until_ready(loss_fast)

    # Validate against pure-JAX reference.
    ref_logits, ref_loss = _reference_forward(
        idx, model.token_embedding_table, targets)

    assert logits.shape == (B * T, vocab_size)
    assert logits3d.shape == (B, T, vocab_size)
    assert jnp.allclose(logits, ref_logits.reshape(B * T, vocab_size),
                        atol=1e-5, rtol=1e-5)
    assert jnp.allclose(logits3d, ref_logits, atol=1e-5, rtol=1e-5)
    assert jnp.allclose(loss, ref_loss, atol=1e-5, rtol=1e-5)
    assert jnp.allclose(loss_fast, ref_loss, atol=1e-5, rtol=1e-5)

    print("KERNEL_OK")
</pallas_src>

<mosaic_0001>
module attributes {stable_mosaic.version = 11 : i64} {
  func.func @_bigram_ce_kernel(%arg0: i32, %arg1: memref<16xi32, #tpu.memory_space<smem>>, %arg2: memref<32x128xf32, #tpu.memory_space<vmem>>, %arg3: memref<16x1xi32, #tpu.memory_space<vmem>>, %arg4: memref<16x128xf32, #tpu.memory_space<vmem>>, %arg5: memref<16x1xf32, #tpu.memory_space<vmem>>) attributes {dimension_semantics = [#tpu.dimension_semantics<parallel>], iteration_bounds = array<i64: 1>, scalar_prefetch = 1 : i64, scratch_operands = 0 : i64, tpu.core_type = #tpu.core_type<tc>, window_params = [{pipeline_mode = #tpu.pipeline_mode<synchronous>, transform_indices = @transform_0, window_bounds = array<i64: 32, 128>}, {transform_indices = @transform_1, window_bounds = array<i64: 16, 1>}, {transform_indices = @transform_2, window_bounds = array<i64: 16, 128>}, {transform_indices = @transform_3, window_bounds = array<i64: 16, 1>}]} {
    %c16_i32 = arith.constant 16 : i32
    %0 = arith.muli %arg0, %c16_i32 : i32
    %c0_i32 = arith.constant 0 : i32
    %1 = arith.addi %0, %c0_i32 : i32
    %2 = arith.index_cast %1 : i32 to index
    %3 = memref.load %arg1[%2] : memref<16xi32, #tpu.memory_space<smem>>
    %4 = arith.index_cast %3 : i32 to index
    %c0 = arith.constant 0 : index
    %5 = vector.load %arg2[%4, %c0] : memref<32x128xf32, #tpu.memory_space<vmem>>, vector<1x128xf32>
    %c0_0 = arith.constant 0 : index
    %c0_1 = arith.constant 0 : index
    %6 = vector.load %arg4[%c0_0, %c0_1] : memref<16x128xf32, #tpu.memory_space<vmem>>, vector<1x128xf32>
    tpu.vector_store %arg4[%c0_0, %c0_1], %5 {strides = array<i32>} : memref<16x128xf32, #tpu.memory_space<vmem>>, vector<1x128xf32>,
    %c1_i32 = arith.constant 1 : i32
    %7 = arith.addi %0, %c1_i32 : i32
    %8 = arith.index_cast %7 : i32 to index
    %9 = memref.load %arg1[%8] : memref<16xi32, #tpu.memory_space<smem>>
    %10 = arith.index_cast %9 : i32 to index
    %c0_2 = arith.constant 0 : index
    %11 = vector.load %arg2[%10, %c0_2] : memref<32x128xf32, #tpu.memory_space<vmem>>, vector<1x128xf32>
    %c1 = arith.constant 1 : index
    %c0_3 = arith.constant 0 : index
    %12 = vector.load %arg4[%c1, %c0_3] : memref<16x128xf32, #tpu.memory_space<vmem>>, vector<1x128xf32>
    tpu.vector_store %arg4[%c1, %c0_3], %11 {strides = array<i32>} : memref<16x128xf32, #tpu.memory_space<vmem>>, vector<1x128xf32>,
    %c2_i32 = arith.constant 2 : i32
    %13 = arith.addi %0, %c2_i32 : i32
    %14 = arith.index_cast %13 : i32 to index
    %15 = memref.load %arg1[%14] : memref<16xi32, #tpu.memory_space<smem>>
    %16 = arith.index_cast %15 : i32 to index
    %c0_4 = arith.constant 0 : index
    %17 = vector.load %arg2[%16, %c0_4] : memref<32x128xf32, #tpu.memory_space<vmem>>, vector<1x128xf32>
    %c2 = arith.constant 2 : index
    %c0_5 = arith.constant 0 : index
    %18 = vector.load %arg4[%c2, %c0_5] : memref<16x128xf32, #tpu.memory_space<vmem>>, vector<1x128xf32>
    tpu.vector_store %arg4[%c2, %c0_5], %17 {strides = array<i32>} : memref<16x128xf32, #tpu.memory_space<vmem>>, vector<1x128xf32>,
    %c3_i32 = arith.constant 3 : i32
    %19 = arith.addi %0, %c3_i32 : i32
    %20 = arith.index_cast %19 : i32 to index
    %21 = memref.load %arg1[%20] : memref<16xi32, #tpu.memory_space<smem>>
    %22 = arith.index_cast %21 : i32 to index
    %c0_6 = arith.constant 0 : index
    %23 = vector.load %arg2[%22, %c0_6] : memref<32x128xf32, #tpu.memory_space<vmem>>, vector<1x128xf32>
    %c3 = arith.constant 3 : index
    %c0_7 = arith.constant 0 : index
    %24 = vector.load %arg4[%c3, %c0_7] : memref<16x128xf32, #tpu.memory_space<vmem>>, vector<1x128xf32>
    tpu.vector_store %arg4[%c3, %c0_7], %23 {strides = array<i32>} : memref<16x128xf32, #tpu.memory_space<vmem>>, vector<1x128xf32>,
    %c4_i32 = arith.constant 4 : i32
    %25 = arith.addi %0, %c4_i32 : i32
    %26 = arith.index_cast %25 : i32 to index
    %27 = memref.load %arg1[%26] : memref<16xi32, #tpu.memory_space<smem>>
    %28 = arith.index_cast %27 : i32 to index
    %c0_8 = arith.constant 0 : index
    %29 = vector.load %arg2[%28, %c0_8] : memref<32x128xf32, #tpu.memory_space<vmem>>, vector<1x128xf32>
    %c4 = arith.constant 4 : index
    %c0_9 = arith.constant 0 : index
    %30 = vector.load %arg4[%c4, %c0_9] : memref<16x128xf32, #tpu.memory_space<vmem>>, vector<1x128xf32>
    tpu.vector_store %arg4[%c4, %c0_9], %29 {strides = array<i32>} : memref<16x128xf32, #tpu.memory_space<vmem>>, vector<1x128xf32>,
    %c5_i32 = arith.constant 5 : i32
    %31 = arith.addi %0, %c5_i32 : i32
    %32 = arith.index_cast %31 : i32 to index
    %33 = memref.load %arg1[%32] : memref<16xi32, #tpu.memory_space<smem>>
    %34 = arith.index_cast %33 : i32 to index
    %c0_10 = arith.constant 0 : index
    %35 = vector.load %arg2[%34, %c0_10] : memref<32x128xf32, #tpu.memory_space<vmem>>, vector<1x128xf32>
    %c5 = arith.constant 5 : index
    %c0_11 = arith.constant 0 : index
    %36 = vector.load %arg4[%c5, %c0_11] : memref<16x128xf32, #tpu.memory_space<vmem>>, vector<1x128xf32>
    tpu.vector_store %arg4[%c5, %c0_11], %35 {strides = array<i32>} : memref<16x128xf32, #tpu.memory_space<vmem>>, vector<1x128xf32>,
    %c6_i32 = arith.constant 6 : i32
    %37 = arith.addi %0, %c6_i32 : i32
    %38 = arith.index_cast %37 : i32 to index
    %39 = memref.load %arg1[%38] : memref<16xi32, #tpu.memory_space<smem>>
    %40 = arith.index_cast %39 : i32 to index
    %c0_12 = arith.constant 0 : index
    %41 = vector.load %arg2[%40, %c0_12] : memref<32x128xf32, #tpu.memory_space<vmem>>, vector<1x128xf32>
    %c6 = arith.constant 6 : index
    %c0_13 = arith.constant 0 : index
    %42 = vector.load %arg4[%c6, %c0_13] : memref<16x128xf32, #tpu.memory_space<vmem>>, vector<1x128xf32>
    tpu.vector_store %arg4[%c6, %c0_13], %41 {strides = array<i32>} : memref<16x128xf32, #tpu.memory_space<vmem>>, vector<1x128xf32>,
    %c7_i32 = arith.constant 7 : i32
    %43 = arith.addi %0, %c7_i32 : i32
    %44 = arith.index_cast %43 : i32 to index
    %45 = memref.load %arg1[%44] : memref<16xi32, #tpu.memory_space<smem>>
    %46 = arith.index_cast %45 : i32 to index
    %c0_14 = arith.constant 0 : index
    %47 = vector.load %arg2[%46, %c0_14] : memref<32x128xf32, #tpu.memory_space<vmem>>, vector<1x128xf32>
    %c7 = arith.constant 7 : index
    %c0_15 = arith.constant 0 : index
    %48 = vector.load %arg4[%c7, %c0_15] : memref<16x128xf32, #tpu.memory_space<vmem>>, vector<1x128xf32>
    tpu.vector_store %arg4[%c7, %c0_15], %47 {strides = array<i32>} : memref<16x128xf32, #tpu.memory_space<vmem>>, vector<1x128xf32>,
    %c8_i32 = arith.constant 8 : i32
    %49 = arith.addi %0, %c8_i32 : i32
    %50 = arith.index_cast %49 : i32 to index
    %51 = memref.load %arg1[%50] : memref<16xi32, #tpu.memory_space<smem>>
    %52 = arith.index_cast %51 : i32 to index
    %c0_16 = arith.constant 0 : index
    %53 = vector.load %arg2[%52, %c0_16] : memref<32x128xf32, #tpu.memory_space<vmem>>, vector<1x128xf32>
    %c8 = arith.constant 8 : index
    %c0_17 = arith.constant 0 : index
    %54 = vector.load %arg4[%c8, %c0_17] : memref<16x128xf32, #tpu.memory_space<vmem>>, vector<1x128xf32>
    tpu.vector_store %arg4[%c8, %c0_17], %53 {strides = array<i32>} : memref<16x128xf32, #tpu.memory_space<vmem>>, vector<1x128xf32>,
    %c9_i32 = arith.constant 9 : i32
    %55 = arith.addi %0, %c9_i32 : i32
    %56 = arith.index_cast %55 : i32 to index
    %57 = memref.load %arg1[%56] : memref<16xi32, #tpu.memory_space<smem>>
    %58 = arith.index_cast %57 : i32 to index
    %c0_18 = arith.constant 0 : index
    %59 = vector.load %arg2[%58, %c0_18] : memref<32x128xf32, #tpu.memory_space<vmem>>, vector<1x128xf32>
    %c9 = arith.constant 9 : index
    %c0_19 = arith.constant 0 : index
    %60 = vector.load %arg4[%c9, %c0_19] : memref<16x128xf32, #tpu.memory_space<vmem>>, vector<1x128xf32>
    tpu.vector_store %arg4[%c9, %c0_19], %59 {strides = array<i32>} : memref<16x128xf32, #tpu.memory_space<vmem>>, vector<1x128xf32>,
    %c10_i32 = arith.constant 10 : i32
    %61 = arith.addi %0, %c10_i32 : i32
    %62 = arith.index_cast %61 : i32 to index
    %63 = memref.load %arg1[%62] : memref<16xi32, #tpu.memory_space<smem>>
    %64 = arith.index_cast %63 : i32 to index
    %c0_20 = arith.constant 0 : index
    %65 = vector.load %arg2[%64, %c0_20] : memref<32x128xf32, #tpu.memory_space<vmem>>, vector<1x128xf32>
    %c10 = arith.constant 10 : index
    %c0_21 = arith.constant 0 : index
    %66 = vector.load %arg4[%c10, %c0_21] : memref<16x128xf32, #tpu.memory_space<vmem>>, vector<1x128xf32>
    tpu.vector_store %arg4[%c10, %c0_21], %65 {strides = array<i32>} : memref<16x128xf32, #tpu.memory_space<vmem>>, vector<1x128xf32>,
    %c11_i32 = arith.constant 11 : i32
    %67 = arith.addi %0, %c11_i32 : i32
    %68 = arith.index_cast %67 : i32 to index
    %69 = memref.load %arg1[%68] : memref<16xi32, #tpu.memory_space<smem>>
    %70 = arith.index_cast %69 : i32 to index
    %c0_22 = arith.constant 0 : index
    %71 = vector.load %arg2[%70, %c0_22] : memref<32x128xf32, #tpu.memory_space<vmem>>, vector<1x128xf32>
    %c11 = arith.constant 11 : index
    %c0_23 = arith.constant 0 : index
    %72 = vector.load %arg4[%c11, %c0_23] : memref<16x128xf32, #tpu.memory_space<vmem>>, vector<1x128xf32>
    tpu.vector_store %arg4[%c11, %c0_23], %71 {strides = array<i32>} : memref<16x128xf32, #tpu.memory_space<vmem>>, vector<1x128xf32>,
    %c12_i32 = arith.constant 12 : i32
    %73 = arith.addi %0, %c12_i32 : i32
    %74 = arith.index_cast %73 : i32 to index
    %75 = memref.load %arg1[%74] : memref<16xi32, #tpu.memory_space<smem>>
    %76 = arith.index_cast %75 : i32 to index
    %c0_24 = arith.constant 0 : index
    %77 = vector.load %arg2[%76, %c0_24] : memref<32x128xf32, #tpu.memory_space<vmem>>, vector<1x128xf32>
    %c12 = arith.constant 12 : index
    %c0_25 = arith.constant 0 : index
    %78 = vector.load %arg4[%c12, %c0_25] : memref<16x128xf32, #tpu.memory_space<vmem>>, vector<1x128xf32>
    tpu.vector_store %arg4[%c12, %c0_25], %77 {strides = array<i32>} : memref<16x128xf32, #tpu.memory_space<vmem>>, vector<1x128xf32>,
    %c13_i32 = arith.constant 13 : i32
    %79 = arith.addi %0, %c13_i32 : i32
    %80 = arith.index_cast %79 : i32 to index
    %81 = memref.load %arg1[%80] : memref<16xi32, #tpu.memory_space<smem>>
    %82 = arith.index_cast %81 : i32 to index
    %c0_26 = arith.constant 0 : index
    %83 = vector.load %arg2[%82, %c0_26] : memref<32x128xf32, #tpu.memory_space<vmem>>, vector<1x128xf32>
    %c13 = arith.constant 13 : index
    %c0_27 = arith.constant 0 : index
    %84 = vector.load %arg4[%c13, %c0_27] : memref<16x128xf32, #tpu.memory_space<vmem>>, vector<1x128xf32>
    tpu.vector_store %arg4[%c13, %c0_27], %83 {strides = array<i32>} : memref<16x128xf32, #tpu.memory_space<vmem>>, vector<1x128xf32>,
    %c14_i32 = arith.constant 14 : i32
    %85 = arith.addi %0, %c14_i32 : i32
    %86 = arith.index_cast %85 : i32 to index
    %87 = memref.load %arg1[%86] : memref<16xi32, #tpu.memory_space<smem>>
    %88 = arith.index_cast %87 : i32 to index
    %c0_28 = arith.constant 0 : index
    %89 = vector.load %arg2[%88, %c0_28] : memref<32x128xf32, #tpu.memory_space<vmem>>, vector<1x128xf32>
    %c14 = arith.constant 14 : index
    %c0_29 = arith.constant 0 : index
    %90 = vector.load %arg4[%c14, %c0_29] : memref<16x128xf32, #tpu.memory_space<vmem>>, vector<1x128xf32>
    tpu.vector_store %arg4[%c14, %c0_29], %89 {strides = array<i32>} : memref<16x128xf32, #tpu.memory_space<vmem>>, vector<1x128xf32>,
    %c15_i32 = arith.constant 15 : i32
    %91 = arith.addi %0, %c15_i32 : i32
    %92 = arith.index_cast %91 : i32 to index
    %93 = memref.load %arg1[%92] : memref<16xi32, #tpu.memory_space<smem>>
    %94 = arith.index_cast %93 : i32 to index
    %c0_30 = arith.constant 0 : index
    %95 = vector.load %arg2[%94, %c0_30] : memref<32x128xf32, #tpu.memory_space<vmem>>, vector<1x128xf32>
    %c15 = arith.constant 15 : index
    %c0_31 = arith.constant 0 : index
    %96 = vector.load %arg4[%c15, %c0_31] : memref<16x128xf32, #tpu.memory_space<vmem>>, vector<1x128xf32>
    tpu.vector_store %arg4[%c15, %c0_31], %95 {strides = array<i32>} : memref<16x128xf32, #tpu.memory_space<vmem>>, vector<1x128xf32>,
    %c0_32 = arith.constant 0 : index
    %c0_33 = arith.constant 0 : index
    %97 = vector.load %arg4[%c0_32, %c0_33] : memref<16x128xf32, #tpu.memory_space<vmem>>, vector<16x128xf32>
    %98 = tpu.iota {dimensions = array<i32: 1>} : vector<16x128xi32>
    %c32_i32 = arith.constant 32 : i32
    %99 = vector.broadcast %c32_i32 : i32 to vector<16x128xi32>
    %100 = arith.cmpi slt, %98, %99 : vector<16x128xi32>
    %cst = arith.constant -1.000000e+30 : f32
    %101 = vector.broadcast %cst : f32 to vector<16x128xf32>
    %102 = arith.select %100, %97, %101 : vector<16x128xi1>, vector<16x128xf32>
    %cst_34 = arith.constant dense<0xFF800000> : vector<16xf32>
    %103 = vector.multi_reduction <maximumf>, %102, %cst_34 [1] : vector<16x128xf32> to vector<16xf32>
    %104 = vector.shape_cast %103 : vector<16xf32> to vector<16x1xf32>
    %105 = vector.broadcast %104 : vector<16x1xf32> to vector<16x128xf32>
    %106 = arith.subf %102, %105 : vector<16x128xf32>
    %107 = math.exp %106 : vector<16x128xf32>
    %cst_35 = arith.constant dense<0.000000e+00> : vector<16xf32>
    %108 = vector.multi_reduction <add>, %107, %cst_35 [1] : vector<16x128xf32> to vector<16xf32>
    %109 = vector.shape_cast %108 : vector<16xf32> to vector<16x1xf32>
    %110 = math.log %109 : vector<16x1xf32>
    %111 = arith.addf %104, %110 : vector<16x1xf32>
    %c0_36 = arith.constant 0 : index
    %c0_37 = arith.constant 0 : index
    %112 = vector.load %arg3[%c0_36, %c0_37] : memref<16x1xi32, #tpu.memory_space<vmem>>, vector<16x1xi32>
    %113 = vector.broadcast %112 : vector<16x1xi32> to vector<16x128xi32>
    %114 = arith.cmpi eq, %98, %113 : vector<16x128xi32>
    %cst_38 = arith.constant 0.000000e+00 : f32
    %115 = vector.broadcast %cst_38 : f32 to vector<16x128xf32>
    %116 = arith.select %114, %97, %115 : vector<16x128xi1>, vector<16x128xf32>
    %cst_39 = arith.constant dense<0.000000e+00> : vector<16xf32>
    %117 = vector.multi_reduction <add>, %116, %cst_39 [1] : vector<16x128xf32> to vector<16xf32>
    %118 = vector.shape_cast %117 : vector<16xf32> to vector<16x1xf32>
    %c16_i32_40 = arith.constant 16 : i32
    %119 = arith.muli %arg0, %c16_i32_40 : i32
    %120 = tpu.iota {dimensions = array<i32: 0>} : vector<16x1xi32>
    %121 = vector.broadcast %119 : i32 to vector<16x1xi32>
    %122 = arith.addi %121, %120 : vector<16x1xi32>
    %c16_i32_41 = arith.constant 16 : i32
    %123 = vector.broadcast %c16_i32_41 : i32 to vector<16x1xi32>
    %124 = arith.cmpi slt, %122, %123 : vector<16x1xi32>
    %125 = arith.subf %111, %118 : vector<16x1xf32>
    %cst_42 = arith.constant 0.000000e+00 : f32
    %126 = vector.broadcast %cst_42 : f32 to vector<16x1xf32>
    %127 = arith.select %124, %125, %126 : vector<16x1xi1>, vector<16x1xf32>
    %c0_43 = arith.constant 0 : index
    %c0_44 = arith.constant 0 : index
    %128 = vector.load %arg5[%c0_43, %c0_44] : memref<16x1xf32, #tpu.memory_space<vmem>>, vector<16x1xf32>
    tpu.vector_store %arg5[%c0_43, %c0_44], %127 {strides = array<i32>} : memref<16x1xf32, #tpu.memory_space<vmem>>, vector<16x1xf32>,
    return
  }
  func.func @transform_0(%arg0: i32, %arg1: memref<16xi32, #tpu.memory_space<smem>>) -> (i32, i32) {
    %c0_i32 = arith.constant 0 : i32
    %c0_i32_0 = arith.constant 0 : i32
    %c0_i32_1 = arith.constant 0 : i32
    return %c0_i32, %c0_i32_0 : i32, i32
  }
  func.func @transform_1(%arg0: i32, %arg1: memref<16xi32, #tpu.memory_space<smem>>) -> (i32, i32) {
    %c0_i32 = arith.constant 0 : i32
    %c0_i32_0 = arith.constant 0 : i32
    return %arg0, %c0_i32 : i32, i32
  }
  func.func @transform_2(%arg0: i32, %arg1: memref<16xi32, #tpu.memory_space<smem>>) -> (i32, i32) {
    %c0_i32 = arith.constant 0 : i32
    %c0_i32_0 = arith.constant 0 : i32
    return %arg0, %c0_i32 : i32, i32
  }
  func.func @transform_3(%arg0: i32, %arg1: memref<16xi32, #tpu.memory_space<smem>>) -> (i32, i32) {
    %c0_i32 = arith.constant 0 : i32
    %c0_i32_0 = arith.constant 0 : i32
    return %arg0, %c0_i32 : i32, i32
  }
}

</mosaic_0001>

<bundles_post_ra>
// kernel: _forward_jit.1
= control target key start
LH: loop header
LB: loop body
LE: loop exit
PB: predicated region body
PF: predicated region fallthrough
CT: control target
= control target key end

     0   :  { %s406_s0 = inlined_call_operand.vmem [shape: s32[16], index: 0, kind: input, shape index: {}]   ;;  %s407_s1 = inlined_call_operand.hbm [shape: f32[32,128], index: 1, kind: input, shape index: {}]   ;;  %s408_s2 = inlined_call_operand.vmem [shape: s32[16,1], index: 2, kind: input, shape index: {}]   ;;  %s409_s3 = inlined_call_operand.hbm [shape: f32[16,128], index: 3, kind: output, shape index: {0}]   ;;  %s410_s4 = inlined_call_operand.vmem [shape: f32[16,1], index: 4, kind: output, shape index: {1}]  }
   0x1   :  { %s10_s17 = sshll.u32 %s406_s0, 4  ;;  %s11_s17 = int_to_ptr.vmem [resolvable:$true] %s10_s17 }
   0x2   :  { %s241_s18 = scalar_lea.vmem %s11_s17, 16  ;;  %p246_p1 = scmp.lt.s32.totalorder %s11_s17, %s11_s17 }
   0x3   :  { %p242_p0 = scmp.ne.s32.totalorder %s11_s17, %s241_s18  ;;  %p247_p2 = scmp.lt.s32.totalorder %s241_s18, %s241_s18 }
   0x5   :  { %p248_p3 = por %p247_p2, %p246_p1 }
   0x7   :  { %p249_p4 = pnand %p248_p3, %p242_p0 }
   0x9   :  { %252 = shalt.err (!%p249_p4)  }
   0xa   :  { %s303_s19 = smov [#allocation3]  }
   0xb   :  { %13 = dma.vmem_to_smem %s11_s17, 16, %s303_s19, [#allocation2] }
   0xc   :  { %297 = dma.done.wait [#allocation2], 16 }
   0xd   :  { %298 = vsyncadd [#allocation2], 4294967280 }
   0xe   :  { %15 = sfence }
   0xf   :  { %16 = vsyncpa [#allocation5], 0 }
  0x10   :  { %17 = vsyncpa [#allocation6], 0  ;;  %s304_s20 = smov [#allocation4]   ;;  %s253_s23 = scalar_lea.hbm %s407_s1, 512 }
  0x11   :  { %s23_s21 = sshll.u32 %s304_s20, 4  ;;  %p254_p5 = scmp.ne.s32.totalorder %s407_s1, %s253_s23  ;;  %s24_s21 = int_to_ptr.vmem [resolvable:$true] %s23_s21 }
  0x12   :  { %p257_p6 = scmp.lt.u32.totalorder %s253_s23, %s407_s1 }
  0x14   :  { %p259_p7 = pnand %p257_p6, %p254_p5 }
  0x16   :  { %262 = shalt.err (!%p259_p7)
}
  0x17   :  { %s263_s28 = scalar_lea.vmem %s24_s21, 512  ;;  %p268_p9 = scmp.lt.s32.totalorder %s24_s21, %s24_s21 }
  0x18   :  { %p264_p8 = scmp.ne.s32.totalorder %s24_s21, %s263_s28  ;;  %p269_p10 = scmp.lt.s32.totalorder %s263_s28, %s263_s28 }
  0x1a   :  { %p270_p11 = por %p269_p10, %p268_p9 }
  0x1c   :  { %p271_p12 = pnand %p270_p11, %p264_p8 }
  0x1e   :  { %274 = shalt.err (!%p271_p12)
}
  0x1f   :  { %s305_s29 = smov 128   ;;  %s306_s30 = smov 8  }
  0x20   :  { %29 = dma.hbm_to_vmem [thread:$0]  %s407_s1, 512, %s24_s21, [#allocation5], %s305_s29, %s305_s29, %s306_s30  }
  0x21   :  { %299 = dma.done.wait [#allocation5], 512  }
  0x22   :  { %300 = vsyncadd [#allocation5], 4294966784  ;;  %s36_s7 = sld [smem:[#allocation3]]  ;;  %s210_s8 = sld [smem:[#allocation3 + $0x1]]  ;;  %v307_v0 = vmov 0   ;;  %v117_v1 = vlaneseq  ;;  %v142_v3 = vld [vmem:[%s408_s2] sm:$0xff] }
  0x23   :  { %231 = vset.pattern.permute.xlu1 %v307_v0  ;;  %232 = vset.pattern.permute.xlu0 %v307_v0  ;;  %s211_s9 = sld [smem:[#allocation3 + $0x2]]  ;;  %s212_s10 = sld [smem:[#allocation3 + $0x3]]  ;;  %v143_v4 = vld [vmem:[%s408_s2 + $0x8] sm:$0xff] }
  0x24   :  { %s213_s11 = sld [smem:[#allocation3 + $0x4]]  ;;  %s214_s12 = sld [smem:[#allocation3 + $0x5]]  ;;  %v364_v2 = vand.u32 127, %v117_v1  ;;  %145 = vperm.xlu1 %231, %v142_v3  }
  0x25   :  { %s352_s13 = sld [smem:[#allocation3 + $0x6]]  ;;  %s354_s14 = sld [smem:[#allocation3 + $0x7]] }
  0x26   :  { %s356_s15 = sld [smem:[#allocation3 + $0x8]]  ;;  %s358_s16 = sld [smem:[#allocation3 + $0x9]]  ;;  %vm119_vm0 = vcmp.lt.s32.totalorder %v364_v2, 32 }
  0x27   :  { %s360_s1 = sld [smem:[#allocation3 + $0xa]]  ;;  %s362_s17 = sld [smem:[#allocation3 + $0xb]] }
  0x28   :  { %s37_s22 = scalar_lea.vmem [#allocation4], %s36_s7  ;;  %s42_s0 = scalar_lea.vmem [#allocation4], %s210_s8  ;;  %148 = vperm.xlu1 %231, %v143_v4  }
  0x29   :  { %v38_v5 = vld [vmem:[%s37_s22] sm:$0x1]  ;;  %s47_s23 = scalar_lea.vmem [#allocation4], %s211_s9  ;;  %s52_s24 = scalar_lea.vmem [#allocation4], %s212_s10 }
  0x2a   :  { %v43_v6 = vld [vmem:[%s42_s0] sm:$0x1]  ;;  %39 = vst [vmem:[#allocation7] sm:$0x1] %v38_v5  ;;  %s57_s25 = scalar_lea.vmem [#allocation4], %s213_s11  ;;  %s62_s2 = scalar_lea.vmem [#allocation4], %s214_s12 }
  0x2b   :  { %44 = vst [vmem:[#allocation7 + $0x1] sm:$0x1] %v43_v6  ;;  %v48_v7 = vld [vmem:[%s47_s23] sm:$0x1]  ;;  %s67_s26 = scalar_lea.vmem [#allocation4], %s352_s13  ;;  %s72_s27 = scalar_lea.vmem [#allocation4], %s354_s14 }
  0x2c   :  { %v53_v8 = vld [vmem:[%s52_s24] sm:$0x1]  ;;  %49 = vst [vmem:[#allocation7 + $0x2] sm:$0x1] %v48_v7  ;;  %s77_s28 = scalar_lea.vmem [#allocation4], %s356_s15  ;;  %s82_s5 = scalar_lea.vmem [#allocation4], %s358_s16 }
  0x2d   :  { %54 = vst [vmem:[#allocation7 + $0x3] sm:$0x1] %v53_v8  ;;  %v58_v9 = vld [vmem:[%s57_s25] sm:$0x1]  ;;  %s87_s6 = scalar_lea.vmem [#allocation4], %s360_s1  ;;  %s92_s7 = scalar_lea.vmem [#allocation4], %s362_s17 }
  0x2e   :  { %v63_v10 = vld [vmem:[%s62_s2] sm:$0x1]  ;;  %59 = vst [vmem:[#allocation7 + $0x4] sm:$0x1] %v58_v9  ;;  %s221_s8 = sld [smem:[#allocation3 + $0xc]]  ;;  %s222_s9 = sld [smem:[#allocation3 + $0xd]] }
  0x2f   :  { %64 = vst [vmem:[#allocation7 + $0x5] sm:$0x1] %v63_v10  ;;  %v68_v11 = vld [vmem:[%s67_s26] sm:$0x1]  ;;  %s223_s10 = sld [smem:[#allocation3 + $0xe]]  ;;  %s224_s11 = sld [smem:[#allocation3 + $0xf]] }
  0x30   :  { %v73_v12 = vld [vmem:[%s72_s27] sm:$0x1]  ;;  %69 = vst [vmem:[#allocation7 + $0x6] sm:$0x1] %v68_v11  ;;  %s308_s16 = smov [#allocation7]  }
  0x31   :  { %74 = vst [vmem:[#allocation7 + $0x7] sm:$0x1] %v73_v12  ;;  %v78_v13 = vld [vmem:[%s77_s28] sm:$0x1]  ;;  %s178_s1 = sshll.u32 %s308_s16, 4  ;;  %s179_s1 = int_to_ptr.vmem [resolvable:$true] %s178_s1 }
  0x32   :  { %v83_v14 = vld [vmem:[%s82_s5] sm:$0x1]  ;;  %79 = vst [vmem:[#allocation7 + $0x8] sm:$0x1] %v78_v13  ;;  %s275_s17 = scalar_lea.vmem %s179_s1, 256  ;;  %p280_p0 = scmp.lt.s32.totalorder %s179_s1, %s179_s1 }
  0x33   :  { %84 = vst [vmem:[#allocation7 + $0x9] sm:$0x1] %v83_v14  ;;  %v88_v15 = vld [vmem:[%s87_s6] sm:$0x1]  ;;  %p276_p13 = scmp.ne.s32.totalorder %s179_s1, %s275_s17  ;;  %p281_p1 = scmp.lt.s32.totalorder %s275_s17, %s275_s17 }
  0x34   :  { %v93_v16 = vld [vmem:[%s92_s7] sm:$0x1]  ;;  %89 = vst [vmem:[#allocation7 + $0xa] sm:$0x1] %v88_v15  ;;  %s97_s12 = scalar_lea.vmem [#allocation4], %s221_s8  ;;  %s102_s13 = scalar_lea.vmem [#allocation4], %s222_s9 }
  0x35   :  { %94 = vst [vmem:[#allocation7 + $0xb] sm:$0x1] %v93_v16  ;;  %v98_v19 = vld [vmem:[%s97_s12] sm:$0x1]  ;;  %s107_s14 = scalar_lea.vmem [#allocation4], %s223_s10  ;;  %s112_s15 = scalar_lea.vmem [#allocation4], %s224_s11 }
  0x36   :  { %99 = vst [vmem:[#allocation7 + $0xc] sm:$0x1] %v98_v19  ;;  %v103_v20 = vld [vmem:[%s102_s13] sm:$0x1]  ;;  %p282_p2 = por %p281_p1, %p280_p0 }
  0x37   :  { %v108_v21 = vld [vmem:[%s107_s14] sm:$0x1]  ;;  %104 = vst [vmem:[#allocation7 + $0xd] sm:$0x1] %v103_v20 }
  0x38   :  { %v115_v17 = vld [vmem:[#allocation7] sm:$0xff]  ;;  %109 = vst [vmem:[#allocation7 + $0xe] sm:$0x1] %v108_v21  ;;  %p283_p3 = pnand %p282_p2, %p276_p13 }
  0x39   :  { %v120_v18 = vsel %vm119_vm0, %v115_v17, -1e+30  ;;  %v113_v22 = vld [vmem:[%s112_s15] sm:$0x1] }
  0x3a   :  { %122 = vmax.xlane.f32.xlu0 %v120_v18  ;;  %114 = vst [vmem:[#allocation7 + $0xf] sm:$0x1] %v113_v22 }
  0x41   :  { %v116_v23 = vld [vmem:[#allocation7 + $0x8] sm:$0xff] }
  0x42   :  { %v121_v24 = vsel %vm119_vm0, %v116_v23, -1e+30 }
  0x43   :  { %124 = vmax.xlane.f32.xlu0 %v121_v24 }
  0xa3   :  { %v146_v28 = vpop.permute.xlu1 %145 }
  0xa4   :  { %vm150_vm1 = vcmp.eq.s32.totalorder %v364_v2, %v146_v28 }
  0xa5   :  { %v152_v34 = vsel %vm150_vm1, %v115_v17, 0.0 }
  0xa7   :  { %v149_v33 = vpop.permute.xlu1 %148 }
  0xa8   :  { %vm151_vm2 = vcmp.eq.s32.totalorder %v364_v2, %v149_v33 }
  0xa9   :  { %v153_v35 = vsel %vm151_vm2, %v116_v23, 0.0 }
  0xc7   :  { %v123_v25 = vpop.xlane.xlu0 %122 }
  0xc8   :  { %v126_v26 = vsub.f32 %v120_v18, %v123_v25 }
  0xca   :  { %v128_v27 = vmul.f32 1.442695, %v126_v26 }
  0xcc   :  { %233 = vpow2.f32 %v128_v27 }
  0xd0   :  { %v125_v29 = vpop.xlane.xlu0 %124 }
  0xd1   :  { %v127_v30 = vsub.f32 %v121_v24, %v125_v29 }
  0xd3   :  { %v130_v31 = vmul.f32 1.442695, %v127_v30 }
  0xd5   :  { %235 = vpow2.f32 %v130_v31 }
  0xd6   :  { %v234_v32 = vpop.eup %233 }
  0xd7   :  { %132 = vadd.xlane.f32.xlu0 %v234_v32 }
  0xdb   :  { %154 = vadd.xlane.f32.xlu0 %v152_v34 }
  0xdf   :  { %156 = vadd.xlane.f32.xlu0 %v153_v35  ;;  %v236_v36 = vpop.eup %235 }
  0xe0   :  { %134 = vadd.xlane.f32.xlu1 %v236_v36 }
  0xe1   :  { %286 = shalt.err (!%p283_p3)
}
  0xe2   :  { %s287_s20 = scalar_lea.hbm %s409_s3, 256 }
  0xe3   :  { %p288_p4 = scmp.ne.s32.totalorder %s409_s3, %s287_s20  ;;  %p291_p5 = scmp.lt.u32.totalorder %s287_s20, %s409_s3 }
  0xe5   :  { %p293_p6 = pnand %p291_p5, %p288_p4 }
  0xe7   :  { %296 = shalt.err (!%p293_p6)
}
  0xe8   :  { %184 = dma.vmem_to_hbm [thread:$0]  %s179_s1, 256, %s409_s3, [#allocation6], %s305_s29, %s305_s29, %s306_s30   ;;  %vm170_vm3 = vcmask 7168  }
 0x164   :  { %v133_v37 = vpop.xlane.xlu0 %132 }
 0x165   :  { %237 = vlog2.f32 %v133_v37 }
 0x168   :  { %v155_v42 = vpop.xlane.xlu0 %154 }
 0x16c   :  { %v157_v47 = vpop.xlane.xlu0 %156 }
 0x16d   :  { %v135_v39 = vpop.xlane.xlu1 %134 }
 0x16e   :  { %239 = vlog2.f32 %v135_v39 }
 0x16f   :  { %v238_v38 = vpop.eup %237 }
 0x170   :  { %v137_v40 = vmul.f32 0.6931472, %v238_v38 }
 0x172   :  { %v140_v41 = vadd.f32 %v137_v40, %v123_v25 }
 0x174   :  { %v166_v43 = vsub.f32 %v140_v41, %v155_v42 }
 0x176   :  { %171 = vst.msk [vmem:[%s410_s4] sm:$0xff] %vm170_vm3, %v166_v43 }
 0x178   :  { %v240_v44 = vpop.eup %239 }
 0x179   :  { %v139_v45 = vmul.f32 0.6931472, %v240_v44 }
 0x17b   :  { %v141_v46 = vadd.f32 %v139_v45, %v125_v29 }
 0x17d   :  { %v167_v48 = vsub.f32 %v141_v46, %v157_v47 }
 0x17f   :  { %172 = vst.msk [vmem:[%s410_s4 + $0x8] sm:$0xff] %vm170_vm3, %v167_v48 }
 0x180   :  { %301 = dma.done.wait [#allocation6], 256  }
 0x181   :  { %302 = vsyncadd [#allocation6], 4294967040 }
 0x182   :  { %192 = vsyncpa [#allocation5], 1 }
 0x183   :  { %193 = vsyncpa [#allocation6], 1 }

</bundles_post_ra>
